<compile_context>
chip_gen: v7x
topology: tpu7x:2x2x1
jax: 0.10.0
libtpu: 0.0.40
codegen_flags: <defaults>
</compile_context>

<pallas_src>
import functools

import jax
import jax.numpy as jnp
from jax.experimental import pallas as pl
from jax.experimental.pallas import tpu as pltpu


def _round_up(a, m):
    return -(-a // m) * m


def _refined_reciprocal(d):
    # EUP approximate reciprocal (separate issue slot) + one Newton-Raphson
    # step to recover ~f32 accuracy.
    inv = pl.reciprocal(d, approx=True)
    return inv * (2.0 - d * inv)


def _ln_rows_kernel(x_ref, g_ref, b_ref, o_ref, *, eps, feat):
    """Plain path: one logical row per block row (feat is the lane axis)."""
    x = x_ref[...].astype(jnp.float32)                          # (tm, feat)
    mean = jnp.sum(x, axis=-1, keepdims=True) * (1.0 / feat)
    centered = x - mean
    # torch.std() default is UNBIASED (divides by N-1); eps is added to std.
    inv_nm1 = 1.0 / (feat - 1) if feat > 1 else float("nan")
    var = jnp.sum(centered * centered, axis=-1, keepdims=True) * inv_nm1
    denom = jnp.sqrt(var) + eps
    normed = centered * _refined_reciprocal(denom)
    out = normed * g_ref[...].astype(jnp.float32) + b_ref[...].astype(jnp.float32)
    o_ref[...] = out.astype(o_ref.dtype)


def _ln_seg_kernel(x_ref, g_ref, b_ref, seg_ref, o_ref, *, eps, feat):
    """Lane-dense path for small feature sizes: k logical rows are packed per
    kernel row (W = k * feat = 128 lanes).  Per-segment mean/var are computed
    with a constant block-diagonal 0/1 matrix on the MXU, which both reduces
    within each segment and broadcasts the result back across its lanes."""
    x = x_ref[...].astype(jnp.float32)                          # (tm, W)
    seg = seg_ref[...]                                          # (W, W) 0/1 f32
    sums = jnp.dot(x, seg, precision=jax.lax.Precision.HIGHEST,
                   preferred_element_type=jnp.float32)
    mean = sums * (1.0 / feat)
    centered = x - mean
    inv_nm1 = 1.0 / (feat - 1) if feat > 1 else float("nan")
    sq = centered * centered
    var = jnp.dot(sq, seg, precision=jax.lax.Precision.HIGHEST,
                  preferred_element_type=jnp.float32) * inv_nm1
    denom = jnp.sqrt(var) + eps
    normed = centered * _refined_reciprocal(denom)
    out = normed * g_ref[...].astype(jnp.float32) + b_ref[...].astype(jnp.float32)
    o_ref[...] = out.astype(o_ref.dtype)


def layer_norm_pallas(x, gamma, beta, eps=1e-6, *,
                      vmem_data_budget_bytes=32 * 1024 * 1024,
                      max_rows_per_tile=2048,
                      vmem_limit_bytes=48 * 1024 * 1024):
    """x: (..., H); gamma/beta: (H,). Returns same shape/dtype as x."""
    orig_shape = x.shape
    feat = int(orig_shape[-1])
    rows = 1
    for d in orig_shape[:-1]:
        rows *= int(d)

    # Lane-dense packing: put k logical rows side-by-side so the kernel's
    # last dim is a multiple of 128 lanes when feat is a small divisor of 128.
    if 1 < feat < 128 and 128 % feat == 0:
        k = 128 // feat
    else:
        k = 1
    width = k * feat

    itemsize = jnp.dtype(x.dtype).itemsize
    sublane = 8 if itemsize >= 4 else (16 if itemsize == 2 else 32)

    # Row-tile sizing: biggest tile whose double-buffered input+output fits
    # the data budget (budget chosen so tiles also fit v7x's 64 MiB VMEM).
    bytes_per_row = 4 * width * itemsize          # 2 bufs in + 2 bufs out
    tm_budget = max(sublane, (vmem_data_budget_bytes // max(bytes_per_row, 1))
                    // sublane * sublane)

    slab_rows = -(-rows // k)                     # rows of the packed view
    tm = min(tm_budget, max_rows_per_tile, _round_up(slab_rows, sublane))
    slab_rows_padded = _round_up(slab_rows, tm)   # pad rows, never one big block
    grid = (slab_rows_padded // tm,)

    total_rows_padded = slab_rows_padded * k
    x2 = x.reshape(rows, feat)
    if total_rows_padded != rows:
        x2 = jnp.pad(x2, ((0, total_rows_padded - rows), (0, 0)))
    x2 = x2.reshape(slab_rows_padded, width)

    g2 = jnp.tile(gamma.reshape(1, feat), (1, k))
    b2 = jnp.tile(beta.reshape(1, feat), (1, k))

    compiler_params = pltpu.CompilerParams(
        dimension_semantics=("parallel",),        # shards rows across TCs on v7x
        vmem_limit_bytes=vmem_limit_bytes,
    )

    if k == 1:
        kernel = functools.partial(_ln_rows_kernel, eps=eps, feat=feat)
        in_specs = [
            pl.BlockSpec((tm, width), lambda i: (i, 0)),
            pl.BlockSpec((1, width), lambda i: (0, 0)),   # resident across steps
            pl.BlockSpec((1, width), lambda i: (0, 0)),
        ]
        args = (x2, g2, b2)
    else:
        seg_ids = jnp.arange(width) // feat
        seg = (seg_ids[:, None] == seg_ids[None, :]).astype(jnp.float32)
        kernel = functools.partial(_ln_seg_kernel, eps=eps, feat=feat)
        in_specs = [
            pl.BlockSpec((tm, width), lambda i: (i, 0)),
            pl.BlockSpec((1, width), lambda i: (0, 0)),
            pl.BlockSpec((1, width), lambda i: (0, 0)),
            pl.BlockSpec((width, width), lambda i: (0, 0)),
        ]
        args = (x2, g2, b2, seg)

    out = pl.pallas_call(
        kernel,
        out_shape=jax.ShapeDtypeStruct((slab_rows_padded, width), x.dtype),
        grid_spec=pltpu.PrefetchScalarGridSpec(
            num_scalar_prefetch=0,
            grid=grid,
            in_specs=in_specs,
            out_specs=pl.BlockSpec((tm, width), lambda i: (i, 0)),
        ),
        compiler_params=compiler_params,
    )(*args)

    out = out.reshape(total_rows_padded, feat)
    if total_rows_padded != rows:
        out = out[:rows]
    return out.reshape(orig_shape)


if __name__ == "__main__":
    batch, seq, hidden = 2, 8, 32
    key = jax.random.PRNGKey(0)
    x = jax.random.normal(key, (batch, seq, hidden), dtype=jnp.float32)

    # Deterministic params matching the PyTorch LayerNorm init:
    # scale (a_2) = ones(features), shift (b_2) = zeros(features).
    gamma = jnp.ones((hidden,), dtype=jnp.float32)
    beta = jnp.zeros((hidden,), dtype=jnp.float32)

    out = layer_norm_pallas(x, gamma, beta, eps=1e-6)
    out = jax.block_until_ready(out)

    # Reference in plain JAX (unbiased std like torch.std default; eps on std).
    mean = jnp.mean(x, axis=-1, keepdims=True)
    std = jnp.sqrt(jnp.sum((x - mean) ** 2, axis=-1, keepdims=True) / (hidden - 1))
    ref = (x - mean) / (std + 1e-6) * gamma + beta

    assert out.shape == x.shape and out.dtype == x.dtype
    assert jnp.allclose(out, ref, atol=1e-4, rtol=1e-4), float(
        jnp.max(jnp.abs(out - ref)))

    print("KERNEL_OK")
</pallas_src>

<mosaic_0001>
module attributes {stable_mosaic.version = 11 : i64} {
  func.func @_ln_seg_kernel(%arg0: i32, %arg1: memref<8x128xf32, #tpu.memory_space<vmem>>, %arg2: memref<1x128xf32, #tpu.memory_space<vmem>>, %arg3: memref<1x128xf32, #tpu.memory_space<vmem>>, %arg4: memref<128x128xf32, #tpu.memory_space<vmem>>, %arg5: memref<8x128xf32, #tpu.memory_space<vmem>>) attributes {dimension_semantics = [#tpu.dimension_semantics<parallel>], iteration_bounds = array<i64: 1>, scalar_prefetch = 0 : i64, scratch_operands = 0 : i64, tpu.core_type = #tpu.core_type<tc>, window_params = [{transform_indices = @transform_0, window_bounds = array<i64: 8, 128>}, {pipeline_mode = #tpu.pipeline_mode<synchronous>, transform_indices = @transform_1, window_bounds = array<i64: 1, 128>}, {pipeline_mode = #tpu.pipeline_mode<synchronous>, transform_indices = @transform_2, window_bounds = array<i64: 1, 128>}, {pipeline_mode = #tpu.pipeline_mode<synchronous>, transform_indices = @transform_3, window_bounds = array<i64: 128, 128>}, {transform_indices = @transform_4, window_bounds = array<i64: 8, 128>}]} {
    %c0 = arith.constant 0 : index
    %c0_0 = arith.constant 0 : index
    %0 = vector.load %arg1[%c0, %c0_0] : memref<8x128xf32, #tpu.memory_space<vmem>>, vector<8x128xf32>
    %c0_1 = arith.constant 0 : index
    %c0_2 = arith.constant 0 : index
    %1 = vector.load %arg4[%c0_1, %c0_2] : memref<128x128xf32, #tpu.memory_space<vmem>>, vector<128x128xf32>
    %cst = arith.constant dense<0.000000e+00> : vector<8x128xf32>
    %2 = tpu.matmul %0, %1, %cst {dimension_numbers = #tpu.dot_dimension_numbers<[1], [0], [0], [1], [0, 0, 1, 1], [], []>, precision = #tpu.contract_precision<fp32>} : vector<8x128xf32>, vector<128x128xf32>, vector<8x128xf32> -> vector<8x128xf32>
    %cst_3 = arith.constant 3.125000e-02 : f32
    %3 = vector.broadcast %cst_3 : f32 to vector<8x128xf32>
    %4 = arith.mulf %2, %3 : vector<8x128xf32>
    %5 = arith.subf %0, %4 : vector<8x128xf32>
    %6 = arith.mulf %5, %5 : vector<8x128xf32>
    %cst_4 = arith.constant dense<0.000000e+00> : vector<8x128xf32>
    %7 = tpu.matmul %6, %1, %cst_4 {dimension_numbers = #tpu.dot_dimension_numbers<[1], [0], [0], [1], [0, 0, 1, 1], [], []>, precision = #tpu.contract_precision<fp32>} : vector<8x128xf32>, vector<128x128xf32>, vector<8x128xf32> -> vector<8x128xf32>
    %cst_5 = arith.constant 0.0322580636 : f32
    %8 = vector.broadcast %cst_5 : f32 to vector<8x128xf32>
    %9 = arith.mulf %7, %8 : vector<8x128xf32>
    %10 = math.sqrt %9 : vector<8x128xf32>
    %cst_6 = arith.constant 9.99999997E-7 : f32
    %11 = vector.broadcast %cst_6 : f32 to vector<8x128xf32>
    %12 = arith.addf %10, %11 : vector<8x128xf32>
    %13 = tpu.reciprocal %12 {approx = true} : vector<8x128xf32> -> vector<8x128xf32>
    %14 = arith.mulf %12, %13 : vector<8x128xf32>
    %cst_7 = arith.constant 2.000000e+00 : f32
    %15 = vector.broadcast %cst_7 : f32 to vector<8x128xf32>
    %16 = arith.subf %15, %14 : vector<8x128xf32>
    %17 = arith.mulf %13, %16 : vector<8x128xf32>
    %18 = arith.mulf %5, %17 : vector<8x128xf32>
    %c0_8 = arith.constant 0 : index
    %c0_9 = arith.constant 0 : index
    %19 = vector.load %arg2[%c0_8, %c0_9] : memref<1x128xf32, #tpu.memory_space<vmem>>, vector<1x128xf32>
    %20 = vector.broadcast %19 : vector<1x128xf32> to vector<8x128xf32>
    %21 = arith.mulf %18, %20 : vector<8x128xf32>
    %c0_10 = arith.constant 0 : index
    %c0_11 = arith.constant 0 : index
    %22 = vector.load %arg3[%c0_10, %c0_11] : memref<1x128xf32, #tpu.memory_space<vmem>>, vector<1x128xf32>
    %23 = vector.broadcast %22 : vector<1x128xf32> to vector<8x128xf32>
    %24 = arith.addf %21, %23 : vector<8x128xf32>
    %c0_12 = arith.constant 0 : index
    %c0_13 = arith.constant 0 : index
    %25 = vector.load %arg5[%c0_12, %c0_13] : memref<8x128xf32, #tpu.memory_space<vmem>>, vector<8x128xf32>
    tpu.vector_store %arg5[%c0_12, %c0_13], %24 {strides = array<i32>} : memref<8x128xf32, #tpu.memory_space<vmem>>, vector<8x128xf32>,
    return
  }
  func.func @transform_0(%arg0: i32) -> (i32, i32) {
    %c0_i32 = arith.constant 0 : i32
    %c0_i32_0 = arith.constant 0 : i32
    return %arg0, %c0_i32 : i32, i32
  }
  func.func @transform_1(%arg0: i32) -> (i32, i32) {
    %c0_i32 = arith.constant 0 : i32
    %c0_i32_0 = arith.constant 0 : i32
    %c0_i32_1 = arith.constant 0 : i32
    return %c0_i32, %c0_i32_0 : i32, i32
  }
  func.func @transform_2(%arg0: i32) -> (i32, i32) {
    %c0_i32 = arith.constant 0 : i32
    %c0_i32_0 = arith.constant 0 : i32
    %c0_i32_1 = arith.constant 0 : i32
    return %c0_i32, %c0_i32_0 : i32, i32
  }
  func.func @transform_3(%arg0: i32) -> (i32, i32) {
    %c0_i32 = arith.constant 0 : i32
    %c0_i32_0 = arith.constant 0 : i32
    %c0_i32_1 = arith.constant 0 : i32
    return %c0_i32, %c0_i32_0 : i32, i32
  }
  func.func @transform_4(%arg0: i32) -> (i32, i32) {
    %c0_i32 = arith.constant 0 : i32
    %c0_i32_0 = arith.constant 0 : i32
    return %arg0, %c0_i32 : i32, i32
  }
}

</mosaic_0001>

<bundles_post_ra>
// kernel: tpu_custom_call.1
= control target key start
LH: loop header
LB: loop body
LE: loop exit
PB: predicated region body
PF: predicated region fallthrough
CT: control target
= control target key end

     0   :  { %9 = vsyncpa [#allocation3], 0  ;;  %s2884_s0 = inlined_call_operand.hbm [shape: f32[8,128], index: 0, kind: input, shape index: {}]   ;;  %s2885_s1 = inlined_call_operand.vmem [shape: f32[1,128], index: 1, kind: input, shape index: {}]   ;;  %s2886_s2 = inlined_call_operand.vmem [shape: f32[1,128], index: 2, kind: input, shape index: {}]   ;;  %s2887_s3 = inlined_call_operand.hbm [shape: f32[128,128], index: 3, kind: input, shape index: {}]   ;;  %s2888_s4 = inlined_call_operand.hbm [shape: f32[8,128], index: 4, kind: output, shape index: {}]  }
   0x1   :  { %10 = vsyncpa [#allocation6], 0 }
   0x2   :  { %11 = vsyncpa [#allocation4], 0  ;;  %s2411_s15 = smov [#allocation2]   ;;  %s2412_s17 = smov [#allocation5]  }
   0x3   :  { %s18_s16 = sshll.u32 %s2411_s15, 4  ;;  %s31_s18 = sshll.u32 %s2412_s17, 4  ;;  %s19_s16 = int_to_ptr.vmem [resolvable:$true] %s18_s16  ;;  %s2444_s18 = int_to_ptr.vmem [resolvable:$true] %s31_s18 }
   0x4   :  { %s2339_s21 = scalar_lea.hbm %s2884_s0, 128 }
   0x5   :  { %p2340_p0 = scmp.ne.s32.totalorder %s2884_s0, %s2339_s21  ;;  %p2343_p1 = scmp.lt.u32.totalorder %s2339_s21, %s2884_s0 }
   0x7   :  { %p2345_p2 = pnand %p2343_p1, %p2340_p0 }
   0x9   :  { %2348 = shalt.err (!%p2345_p2)
}
   0xa   :  { %s2349_s26 = scalar_lea.vmem %s19_s16, 128  ;;  %p2354_p4 = scmp.lt.s32.totalorder %s19_s16, %s19_s16 }
   0xb   :  { %p2350_p3 = scmp.ne.s32.totalorder %s19_s16, %s2349_s26  ;;  %p2355_p5 = scmp.lt.s32.totalorder %s2349_s26, %s2349_s26 }
   0xd   :  { %p2356_p6 = por %p2355_p5, %p2354_p4 }
   0xf   :  { %p2357_p7 = pnand %p2356_p6, %p2350_p3 }
  0x11   :  { %2360 = shalt.err (!%p2357_p7)
}
  0x12   :  { %21 = dma.hbm_to_vmem [thread:$0]  %s2884_s0, 128, %s19_s16, [#allocation3]  }
  0x13   :  { %s2361_s5 = scalar_lea.hbm %s2887_s3, 2048 }
  0x14   :  { %p2362_p8 = scmp.ne.s32.totalorder %s2887_s3, %s2361_s5  ;;  %p2365_p9 = scmp.lt.u32.totalorder %s2361_s5, %s2887_s3 }
  0x16   :  { %p2367_p10 = pnand %p2365_p9, %p2362_p8 }
  0x18   :  { %2370 = shalt.err (!%p2367_p10)
}
  0x19   :  { %s2371_s10 = scalar_lea.vmem %s2444_s18, 2048  ;;  %p2376_p12 = scmp.lt.s32.totalorder %s2444_s18, %s2444_s18 }
  0x1a   :  { %p2372_p11 = scmp.ne.s32.totalorder %s2444_s18, %s2371_s10  ;;  %p2377_p13 = scmp.lt.s32.totalorder %s2371_s10, %s2371_s10 }
  0x1c   :  { %p2378_p0 = por %p2377_p13, %p2376_p12 }
  0x1e   :  { %p2379_p1 = pnand %p2378_p0, %p2372_p11 }
  0x20   :  { %2382 = shalt.err (!%p2379_p1)
}
  0x21   :  { %s2413_s0 = smov 128   ;;  %s2414_s11 = smov 8  }
  0x22   :  { %37 = dma.hbm_to_vmem [thread:$0]  %s2887_s3, 2048, %s2444_s18, [#allocation6], %s2413_s0, %s2413_s0, %s2414_s11  }
  0x23   :  { %2405 = dma.done.wait [#allocation3], 128  }
  0x24   :  { %2406 = vsyncadd [#allocation3], 4294967168 }
  0x25   :  { %2407 = dma.done.wait [#allocation6], 2048  }
  0x26   :  { %2408 = vsyncadd [#allocation6], 4294965248  ;;  %v2415_v0 = vmov 0.0|0.0   ;;  %vm2416_vm0 = vmmov 0   ;;  %v2417_v1 = vmov 0.0   ;;  %v45_v2 = vld [vmem:[#allocation5] sm:$0xff] }
  0x27   :  { %2019 = vmatprep.subr.bf16.mxu0 %v2415_v0  ;;  %1631 = vmatprep.mubr.msk.f32.mxu0 %vm2416_vm0, %v2417_v1  ;;  %v46_v3 = vld [vmem:[#allocation5 + $0x8] sm:$0xff]  ;;  %v47_v4 = vld [vmem:[#allocation5 + $0x10] sm:$0xff]  ;;  %v62_v5 = vand.u32 4294901760, %v45_v2  ;;  %v48_v7 = vld [vmem:[#allocation5 + $0x18] sm:$0xff]  ;;  %s2418_s17 = smov [#allocation7]  }
  0x28   :  { %2163 = vmatprep.subr.bf16.mxu1 %v2415_v0  ;;  %1841 = vmatprep.mubr.msk.f32.mxu1 %vm2416_vm0, %v2417_v1  ;;  %v65_v6 = vand.u32 4294901760, %v46_v3  ;;  %v68_v8 = vand.u32 4294901760, %v47_v4  ;;  %v71_v9 = vand.u32 4294901760, %v48_v7  ;;  %v49_v10 = vld [vmem:[#allocation5 + $0x20] sm:$0xff]  ;;  %v50_v11 = vld [vmem:[#allocation5 + $0x28] sm:$0xff]  ;;  %v51_v16 = vld [vmem:[#allocation5 + $0x30] sm:$0xff] }
  0x29   :  { %v74_v14 = vand.u32 4294901760, %v49_v10  ;;  %v77_v15 = vand.u32 4294901760, %v50_v11  ;;  %v52_v17 = vld [vmem:[#allocation5 + $0x38] sm:$0xff]  ;;  %v80_v19 = vand.u32 4294901760, %v51_v16  ;;  %v53_v21 = vld [vmem:[#allocation5 + $0x40] sm:$0xff]  ;;  %v54_v23 = vld [vmem:[#allocation5 + $0x48] sm:$0xff]  ;;  %v2503_v34 = vsub.f32 %v45_v2, %v62_v5 }
  0x2a   :  { %v2481_v12 = vpack.c.bf16 %v65_v6, %v62_v5  ;;  %v2484_v13 = vpack.c.bf16 %v71_v9, %v68_v8  ;;  %v83_v20 = vand.u32 4294901760, %v52_v17  ;;  %v2492_v22 = vld [vmem:[#allocation2] sm:$0xff]  ;;  %v55_v24 = vld [vmem:[#allocation5 + $0x50] sm:$0xff]  ;;  %v57_v26 = vld [vmem:[#allocation5 + $0x60] sm:$0xff]  ;;  %v86_v27 = vand.u32 4294901760, %v53_v21  ;;  %s1383_s18 = sshll.u32 %s2418_s17, 4  ;;  %s1384_s18 = int_to_ptr.vmem [resolvable:$true] %s1383_s18 }
  0x2b   :  { %v2490_v18 = vpack.c.bf16 %v77_v15, %v74_v14  ;;  %v56_v25 = vld [vmem:[#allocation5 + $0x58] sm:$0xff]  ;;  %v58_v28 = vld [vmem:[#allocation5 + $0x68] sm:$0xff]  ;;  %v59_v29 = vld [vmem:[#allocation5 + $0x70] sm:$0xff]  ;;  %v2498_v31 = vand.u32 4294901760, %v2492_v22  ;;  %v89_v33 = vand.u32 4294901760, %v54_v23  ;;  %v2505_v35 = vsub.f32 %v46_v3, %v65_v6  ;;  %s2383_s19 = scalar_lea.vmem %s1384_s18, 128  ;;  %p2388_p3 = scmp.lt.s32.totalorder %s1384_s18, %s1384_s18 }
  0x2c   :  { %2021 = vmatpush3.bf16.msra.mxu0 %v2481_v12  ;;  %2165 = vmatpush3.bf16.msra.mxu1 %v2481_v12  ;;  %v60_v30 = vld [vmem:[#allocation5 + $0x78] sm:$0xff]  ;;  %v2501_v32 = vpack.c.bf16 %v83_v20, %v80_v19  ;;  %v92_v36 = vand.u32 4294901760, %v55_v24  ;;  %v95_v37 = vand.u32 4294901760, %v56_v25  ;;  %v98_v38 = vand.u32 4294901760, %v57_v26  ;;  %p2384_p2 = scmp.ne.s32.totalorder %s1384_s18, %s2383_s19  ;;  %p2389_p4 = scmp.lt.s32.totalorder %s2383_s19, %s2383_s19 }
  0x2d   :  { %2022 = vmatprep.subr.bf16.mxu0 %v2415_v0  ;;  %2166 = vmatprep.subr.bf16.mxu1 %v2415_v0  ;;  %v101_v39 = vand.u32 4294901760, %v58_v28  ;;  %v104_v40 = vand.u32 4294901760, %v59_v29  ;;  %v107_v41 = vand.u32 4294901760, %v60_v30  ;;  %v2512_v42 = vsub.f32 %v2492_v22, %v2498_v31 }
  0x2e   :  { %v2514_v43 = vsub.f32 %v47_v4, %v68_v8  ;;  %v2517_v44 = vpack.c.bf16 %v89_v33, %v86_v27  ;;  %v155_v45 = vand.u32 4294901760, %v2503_v34  ;;  %v162_v46 = vand.u32 4294901760, %v2505_v35  ;;  %p2390_p5 = por %p2389_p4, %p2388_p3 }
  0x2f   :  { %v2521_v47 = vsub.f32 %v48_v7, %v71_v9  ;;  %v2525_v48 = vsub.f32 %v49_v10, %v74_v14  ;;  %v2528_v49 = vpack.c.bf16 %v95_v37, %v92_v36  ;;  %v2530_v50 = vpack.c.bf16 %v101_v39, %v98_v38 }
  0x30   :  { %2024 = vmatpush3.bf16.msra.mxu0 %v2484_v13  ;;  %2168 = vmatpush3.bf16.msra.mxu1 %v2484_v13  ;;  %v2532_v51 = vpack.c.bf16 %v107_v41, %v104_v40  ;;  %v144_v52 = vand.u32 4294901760, %v2512_v42  ;;  %v169_v53 = vand.u32 4294901760, %v2514_v43  ;;  %v2536_v54 = vsub.f32 %v50_v11, %v77_v15  ;;  %p2391_p6 = pnand %p2390_p5, %p2384_p2 }
  0x31   :  { %2025 = vmatprep.subr.bf16.mxu0 %v2415_v0  ;;  %2169 = vmatprep.subr.bf16.mxu1 %v2415_v0  ;;  %v2538_v55 = vsub.f32 %v51_v16, %v80_v19  ;;  %v156_v56 = vsub.f32 %v2503_v34, %v155_v45  ;;  %v163_v57 = vsub.f32 %v2505_v35, %v162_v46  ;;  %v176_v58 = vand.u32 4294901760, %v2521_v47 }
  0x32   :  { %v2544_v59 = vsub.f32 %v52_v17, %v83_v20  ;;  %v183_v60 = vand.u32 4294901760, %v2525_v48  ;;  %v2549_v61 = vsub.f32 %v53_v21, %v86_v27  ;;  %v2551_v62 = vsub.f32 %v54_v23, %v89_v33 }
  0x33   :  { %v2553_v63 = vsub.f32 %v55_v24, %v92_v36  ;;  %v2556_v2 = vsub.f32 %v56_v25, %v95_v37  ;;  %v2558_v3 = vsub.f32 %v57_v26, %v98_v38  ;;  %v2560_v4 = vsub.f32 %v58_v28, %v101_v39 }
  0x34   :  { %2027 = vmatpush3.bf16.msra.mxu0 %v2490_v18  ;;  %2171 = vmatpush3.bf16.msra.mxu1 %v2490_v18  ;;  %v2562_v5 = vsub.f32 %v59_v29, %v104_v40  ;;  %v145_v6 = vsub.f32 %v2512_v42, %v144_v52  ;;  %v170_v7 = vsub.f32 %v2514_v43, %v169_v53  ;;  %v190_v8 = vand.u32 4294901760, %v2536_v54 }
  0x35   :  { %2028 = vmatprep.subr.bf16.mxu0 %v2415_v0  ;;  %2172 = vmatprep.subr.bf16.mxu1 %v2415_v0  ;;  %v2569_v9 = vsub.f32 %v60_v30, %v107_v41  ;;  %v157_v10 = vand.u32 4294901760, %v156_v56  ;;  %v164_v11 = vand.u32 4294901760, %v163_v57  ;;  %v177_v14 = vsub.f32 %v2521_v47, %v176_v58 }
  0x36   :  { %v197_v15 = vand.u32 4294901760, %v2538_v55  ;;  %v204_v16 = vand.u32 4294901760, %v2544_v59  ;;  %v211_v17 = vand.u32 4294901760, %v2549_v61  ;;  %v218_v19 = vand.u32 4294901760, %v2551_v62 }
  0x37   :  { %v225_v20 = vand.u32 4294901760, %v2553_v63  ;;  %v232_v21 = vand.u32 4294901760, %v2556_v2  ;;  %v239_v23 = vand.u32 4294901760, %v2558_v3  ;;  %v246_v24 = vand.u32 4294901760, %v2560_v4 }
  0x38   :  { %2030 = vmatpush3.bf16.msra.mxu0 %v2501_v32  ;;  %2174 = vmatpush3.bf16.msra.mxu1 %v2501_v32  ;;  %v253_v25 = vand.u32 4294901760, %v2562_v5  ;;  %v260_v26 = vand.u32 4294901760, %v2569_v9  ;;  %v2586_v27 = vpack.c.bf16 %v162_v46, %v155_v45  ;;  %v2588_v28 = vpack.c.bf16 %v176_v58, %v169_v53 }
  0x39   :  { %2031 = vmatprep.subr.bf16.mxu0 %v2415_v0  ;;  %2175 = vmatprep.subr.bf16.mxu1 %v2415_v0  ;;  %v2590_v29 = vpack.c.bf16 %v190_v8, %v183_v60  ;;  %v2593_v30 = vpack.c.bf16 %v204_v16, %v197_v15  ;;  %v2595_v33 = vpack.c.bf16 %v218_v19, %v211_v17  ;;  %v146_v39 = vand.u32 4294901760, %v145_v6 }
  0x3a   :  { %v2597_v36 = vpack.c.bf16 %v232_v21, %v225_v20  ;;  %v2599_v37 = vpack.c.bf16 %v246_v24, %v239_v23  ;;  %v2602_v38 = vpack.c.bf16 %v260_v26, %v253_v25  ;;  %v184_v40 = vsub.f32 %v2525_v48, %v183_v60 }
  0x3b   :  { %v2608_v41 = vpack.c.bf16 %v164_v11, %v157_v10  ;;  %v171_v45 = vand.u32 4294901760, %v170_v7  ;;  %v178_v46 = vand.u32 4294901760, %v177_v14  ;;  %v191_v53 = vsub.f32 %v2536_v54, %v190_v8 }
  0x3c   :  { %2033 = vmatpush3.bf16.msra.mxu0 %v2517_v44  ;;  %2177 = vmatpush3.bf16.msra.mxu1 %v2517_v44  ;;  %v198_v56 = vsub.f32 %v2538_v55, %v197_v15  ;;  %v185_v58 = vand.u32 4294901760, %v184_v40  ;;  %v205_v6 = vsub.f32 %v2544_v59, %v204_v16  ;;  %v212_v11 = vsub.f32 %v2549_v61, %v211_v17 }
  0x3d   :  { %2034 = vmatprep.subr.bf16.mxu0 %v2415_v0  ;;  %2178 = vmatprep.subr.bf16.mxu1 %v2415_v0  ;;  %v2616_v57 = vpack.c.bf16 %v178_v46, %v171_v45  ;;  %v192_v60 = vand.u32 4294901760, %v191_v53  ;;  %v219_v14 = vsub.f32 %v2551_v62, %v218_v19  ;;  %v226_v15 = vsub.f32 %v2553_v63, %v225_v20 }
  0x3e   :  { %v199_v7 = vand.u32 4294901760, %v198_v56  ;;  %v206_v10 = vand.u32 4294901760, %v205_v6  ;;  %v233_v45 = vsub.f32 %v2556_v2, %v232_v21  ;;  %v240_v46 = vsub.f32 %v2558_v3, %v239_v23 }
  0x3f   :  { %v2623_v8 = vpack.c.bf16 %v192_v60, %v185_v58  ;;  %v220_v40 = vand.u32 4294901760, %v219_v14  ;;  %v227_v19 = vand.u32 4294901760, %v226_v15  ;;  %v247_v20 = vsub.f32 %v2560_v4, %v246_v24 }
  0x40   :  { %2036 = vmatpush3.bf16.msra.mxu0 %v2528_v49  ;;  %2180 = vmatpush3.bf16.msra.mxu1 %v2528_v49  ;;  %v2630_v16 = vpack.c.bf16 %v206_v10, %v199_v7  ;;  %v234_v53 = vand.u32 4294901760, %v233_v45  ;;  %v254_v56 = vsub.f32 %v2562_v5, %v253_v25  ;;  %v241_v21 = vand.u32 4294901760, %v240_v46 }
  0x41   :  { %2037 = vmatprep.subr.bf16.mxu0 %v2415_v0  ;;  %2181 = vmatprep.subr.bf16.mxu1 %v2415_v0  ;;  %v248_v60 = vand.u32 4294901760, %v247_v20  ;;  %v261_v23 = vsub.f32 %v2569_v9, %v260_v26  ;;  %v2657_v26 = vpack.c.bf16 %v2505_v35, %v2503_v34  ;;  %v2664_v10 = vpack.c.bf16 %v2521_v47, %v2514_v43 }
  0x42   :  { %v2642_v58 = vpack.c.bf16 %v234_v53, %v227_v19  ;;  %v255_v7 = vand.u32 4294901760, %v254_v56  ;;  %v2672_v34 = vpack.c.bf16 %v2536_v54, %v2525_v48  ;;  %v2678_v35 = vpack.c.bf16 %v2544_v59, %v2538_v55 }
  0x43   :  { %v2647_v6 = vpack.c.bf16 %v248_v60, %v241_v21  ;;  %v262_v24 = vand.u32 4294901760, %v261_v23  ;;  %v2684_v43 = vpack.c.bf16 %v2551_v62, %v2549_v61  ;;  %v2690_v47 = vpack.c.bf16 %v2556_v2, %v2553_v63 }
  0x44   :  { %2039 = vmatpush3.bf16.msra.mxu0 %v2530_v50  ;;  %2183 = vmatpush3.bf16.msra.mxu1 %v2530_v50  ;;  %v2696_v48 = vpack.c.bf16 %v2560_v4, %v2558_v3  ;;  %v2702_v54 = vpack.c.bf16 %v2569_v9, %v2562_v5 }
  0x45   :  { %2040 = vmatprep.subr.bf16.mxu0 %v2415_v0  ;;  %2184 = vmatprep.subr.bf16.mxu1 %v2415_v0  ;;  %v2651_v25 = vpack.c.bf16 %v262_v24, %v255_v7 }
  0x48   :  { %2042 = vmatpush3.bf16.msra.mxu0 %v2532_v51  ;;  %2186 = vmatpush3.bf16.msra.mxu1 %v2532_v51 }
  0x49   :  { %2043 = vmatprep.subr.bf16.mxu0 %v2415_v0  ;;  %2187 = vmatprep.subr.bf16.mxu1 %v2415_v0 }
  0x4b   :  { %1632 = vmatmul.mubr.f32.vlgmr.msra.gmra.mrb[0].mxu0 %v146_v39  ;;  %v213_v39 = vand.u32 4294901760, %v212_v11 }
  0x4c   :  { %2045 = vmatpush3.bf16.msra.mxu0 %v2608_v41  ;;  %1666 = vmatprep.mubr.msk.f32.mxu0 %vm2416_vm0, %v2417_v1 }
  0x4d   :  { %2046 = vmatprep.subr.bf16.mxu0 %v2415_v0  ;;  %v2636_v17 = vpack.c.bf16 %v220_v40, %v213_v39 }
  0x50   :  { %2048 = vmatpush3.bf16.msra.mxu0 %v2616_v57 }
  0x51   :  { %2049 = vmatprep.subr.bf16.mxu0 %v2415_v0 }
  0x54   :  { %2051 = vmatpush3.bf16.msra.mxu0 %v2623_v8 }
  0x55   :  { %2052 = vmatprep.subr.bf16.mxu0 %v2415_v0 }
  0x58   :  { %2054 = vmatpush3.bf16.msra.mxu0 %v2630_v16 }
  0x59   :  { %2055 = vmatprep.subr.bf16.mxu0 %v2415_v0 }
  0x5c   :  { %2057 = vmatpush3.bf16.msra.mxu0 %v2636_v17 }
  0x5d   :  { %2058 = vmatprep.subr.bf16.mxu0 %v2415_v0 }
  0x60   :  { %2060 = vmatpush3.bf16.msra.mxu0 %v2642_v58 }
  0x61   :  { %2061 = vmatprep.subr.bf16.mxu0 %v2415_v0 }
  0x64   :  { %2063 = vmatpush3.bf16.msra.mxu0 %v2647_v6 }
  0x65   :  { %2064 = vmatprep.subr.bf16.mxu0 %v2415_v0 }
  0x68   :  { %2066 = vmatpush3.bf16.msra.mxu0 %v2651_v25 }
  0x69   :  { %2067 = vmatprep.subr.bf16.mxu0 %v2415_v0 }
  0x6b   :  { %1667 = vmatmul.mubr.f32.vlgmr.msra.gmra.mrb[0].mxu0 %v2498_v31 }
  0x6c   :  { %2069 = vmatpush3.bf16.msra.mxu0 %v2657_v26  ;;  %1701 = vmatprep.mubr.msk.f32.mxu0 %vm2416_vm0, %v2417_v1 }
  0x6d   :  { %2070 = vmatprep.subr.bf16.mxu0 %v2415_v0 }
  0x70   :  { %2072 = vmatpush3.bf16.msra.mxu0 %v2664_v10 }
  0x71   :  { %2073 = vmatprep.subr.bf16.mxu0 %v2415_v0 }
  0x74   :  { %2075 = vmatpush3.bf16.msra.mxu0 %v2672_v34 }
  0x75   :  { %2076 = vmatprep.subr.bf16.mxu0 %v2415_v0 }
  0x78   :  { %2078 = vmatpush3.bf16.msra.mxu0 %v2678_v35 }
  0x79   :  { %2079 = vmatprep.subr.bf16.mxu0 %v2415_v0 }
  0x7c   :  { %2081 = vmatpush3.bf16.msra.mxu0 %v2684_v43 }
  0x7d   :  { %2082 = vmatprep.subr.bf16.mxu0 %v2415_v0 }
  0x80   :  { %2084 = vmatpush3.bf16.msra.mxu0 %v2690_v47 }
  0x81   :  { %2085 = vmatprep.subr.bf16.mxu0 %v2415_v0 }
  0x84   :  { %2087 = vmatpush3.bf16.msra.mxu0 %v2696_v48 }
  0x85   :  { %2088 = vmatprep.subr.bf16.mxu0 %v2415_v0 }
  0x88   :  { %2090 = vmatpush3.bf16.msra.mxu0 %v2702_v54 }
  0x89   :  { %2091 = vmatprep.subr.bf16.mxu0 %v2415_v0 }
  0x8b   :  { %1702 = vmatmul.mubr.f32.vlgmr.msra.gmra.mrb[0].mxu0 %v2512_v42 }
  0x8c   :  { %2093 = vmatpush3.bf16.msra.mxu0 %v2481_v12  ;;  %1736 = vmatprep.mubr.msk.f32.mxu0 %vm2416_vm0, %v2417_v1 }
  0x8d   :  { %2094 = vmatprep.subr.bf16.mxu0 %v2415_v0 }
  0x90   :  { %2096 = vmatpush3.bf16.msra.mxu0 %v2484_v13 }
  0x91   :  { %2097 = vmatprep.subr.bf16.mxu0 %v2415_v0 }
  0x94   :  { %2099 = vmatpush3.bf16.msra.mxu0 %v2490_v18 }
  0x95   :  { %2100 = vmatprep.subr.bf16.mxu0 %v2415_v0 }
  0x98   :  { %2102 = vmatpush3.bf16.msra.mxu0 %v2501_v32 }
  0x99   :  { %2103 = vmatprep.subr.bf16.mxu0 %v2415_v0 }
  0x9c   :  { %2105 = vmatpush3.bf16.msra.mxu0 %v2517_v44 }
  0x9d   :  { %2106 = vmatprep.subr.bf16.mxu0 %v2415_v0 }
  0xa0   :  { %2108 = vmatpush3.bf16.msra.mxu0 %v2528_v49 }
  0xa1   :  { %2109 = vmatprep.subr.bf16.mxu0 %v2415_v0 }
  0xa4   :  { %2111 = vmatpush3.bf16.msra.mxu0 %v2530_v50 }
  0xa5   :  { %2112 = vmatprep.subr.bf16.mxu0 %v2415_v0 }
  0xa8   :  { %2114 = vmatpush3.bf16.msra.mxu0 %v2532_v51 }
  0xa9   :  { %2115 = vmatprep.subr.bf16.mxu0 %v2415_v0 }
  0xab   :  { %1737 = vmatmul.mubr.f32.vlgmr.msra.gmra.mrb[0].mxu0 %v144_v52 }
  0xac   :  { %2117 = vmatpush3.bf16.msra.mxu0 %v2586_v27  ;;  %1771 = vmatprep.mubr.msk.f32.mxu0 %vm2416_vm0, %v2417_v1 }
  0xad   :  { %2118 = vmatprep.subr.bf16.mxu0 %v2415_v0 }
  0xb0   :  { %2120 = vmatpush3.bf16.msra.mxu0 %v2588_v28 }
  0xb1   :  { %2121 = vmatprep.subr.bf16.mxu0 %v2415_v0 }
  0xb4   :  { %2123 = vmatpush3.bf16.msra.mxu0 %v2590_v29 }
  0xb5   :  { %2124 = vmatprep.subr.bf16.mxu0 %v2415_v0 }
  0xb8   :  { %2126 = vmatpush3.bf16.msra.mxu0 %v2593_v30 }
  0xb9   :  { %2127 = vmatprep.subr.bf16.mxu0 %v2415_v0 }
  0xbc   :  { %2129 = vmatpush3.bf16.msra.mxu0 %v2595_v33 }
  0xbd   :  { %2130 = vmatprep.subr.bf16.mxu0 %v2415_v0 }
  0xc0   :  { %2132 = vmatpush3.bf16.msra.mxu0 %v2597_v36 }
  0xc1   :  { %2133 = vmatprep.subr.bf16.mxu0 %v2415_v0 }
  0xc4   :  { %2135 = vmatpush3.bf16.msra.mxu0 %v2599_v37 }
  0xc5   :  { %2136 = vmatprep.subr.bf16.mxu0 %v2415_v0 }
  0xc8   :  { %2138 = vmatpush3.bf16.msra.mxu0 %v2602_v38 }
  0xc9   :  { %2139 = vmatprep.subr.bf16.mxu0 %v2415_v0 }
  0xcb   :  { %1772 = vmatmul.mubr.f32.vlgmr.msra.gmra.mrb[0].mxu0 %v2498_v31 }
  0xcc   :  { %2141 = vmatpush3.bf16.msra.mxu0 %v2481_v12  ;;  %1806 = vmatprep.mubr.msk.f32.mxu0 %vm2416_vm0, %v2417_v1 }
  0xcd   :  { %2142 = vmatprep.subr.bf16.mxu0 %v2415_v0 }
  0xd0   :  { %2144 = vmatpush3.bf16.msra.mxu0 %v2484_v13 }
  0xd1   :  { %2145 = vmatprep.subr.bf16.mxu0 %v2415_v0 }
  0xd4   :  { %2147 = vmatpush3.bf16.msra.mxu0 %v2490_v18 }
  0xd5   :  { %2148 = vmatprep.subr.bf16.mxu0 %v2415_v0 }
  0xd8   :  { %2150 = vmatpush3.bf16.msra.mxu0 %v2501_v32 }
  0xd9   :  { %2151 = vmatprep.subr.bf16.mxu0 %v2415_v0 }
  0xdc   :  { %2153 = vmatpush3.bf16.msra.mxu0 %v2517_v44 }
  0xdd   :  { %2154 = vmatprep.subr.bf16.mxu0 %v2415_v0 }
  0xe0   :  { %2156 = vmatpush3.bf16.msra.mxu0 %v2528_v49 }
  0xe1   :  { %2157 = vmatprep.subr.bf16.mxu0 %v2415_v0 }
  0xe4   :  { %2159 = vmatpush3.bf16.msra.mxu0 %v2530_v50 }
  0xe5   :  { %2160 = vmatprep.subr.bf16.mxu0 %v2415_v0 }
  0xe8   :  { %2162 = vmatpush3.bf16.msra.mxu0 %v2532_v51 }
  0xeb   :  { %1807 = vmatmul.mubr.f32.vlgmr.msra.gmra.mrb[0].mxu0 %v2498_v31 }
 0x1be   :  { %v698_v42 = vpop.f32.mrb[0].mxu0 }
 0x1bf   :  { %v702_v52 = vmul.f32 0.03125, %v698_v42  ;;  %v1808_v55 = vpop.f32.mrb[1].mxu0 }
 0x1c1   :  { %v2766_v59 = vsub.f32 %v2492_v22, %v702_v52 }
 0x1c3   :  { %v704_v61 = vmul.f32 %v2766_v59, %v2766_v59 }
 0x1c5   :  { %v2770_v62 = vand.u32 4294901760, %v704_v61 }
 0x1c7   :  { %v787_v63 = vsub.f32 %v704_v61, %v2770_v62 }
 0x1c9   :  { %v788_v2 = vand.u32 4294901760, %v787_v63 }
 0x1cb   :  { %v789_v3 = vsub.f32 %v787_v63, %v788_v2 }
 0x1cd   :  { %v790_v4 = vand.u32 4294901760, %v789_v3 }
 0x1cf   :  { %1842 = vmatmul.mubr.f32.vlgmr.msra.gmra.mrb[0].mxu1 %v790_v4 }
 0x1d0   :  { %2189 = vmatpush3.bf16.msra.mxu1 %v2608_v41  ;;  %1876 = vmatprep.mubr.msk.f32.mxu1 %vm2416_vm0, %v2417_v1 }
 0x1d1   :  { %2190 = vmatprep.subr.bf16.mxu1 %v2415_v0 }
 0x1d4   :  { %2192 = vmatpush3.bf16.msra.mxu1 %v2616_v57 }
 0x1d5   :  { %2193 = vmatprep.subr.bf16.mxu1 %v2415_v0 }
 0x1d8   :  { %2195 = vmatpush3.bf16.msra.mxu1 %v2623_v8 }
 0x1d9   :  { %2196 = vmatprep.subr.bf16.mxu1 %v2415_v0 }
 0x1dc   :  { %2198 = vmatpush3.bf16.msra.mxu1 %v2630_v16 }
 0x1dd   :  { %2199 = vmatprep.subr.bf16.mxu1 %v2415_v0 }
 0x1e0   :  { %2201 = vmatpush3.bf16.msra.mxu1 %v2636_v17 }
 0x1e1   :  { %2202 = vmatprep.subr.bf16.mxu1 %v2415_v0 }
 0x1e4   :  { %2204 = vmatpush3.bf16.msra.mxu1 %v2642_v58 }
 0x1e5   :  { %2205 = vmatprep.subr.bf16.mxu1 %v2415_v0 }
 0x1e8   :  { %2207 = vmatpush3.bf16.msra.mxu1 %v2647_v6 }
 0x1e9   :  { %2208 = vmatprep.subr.bf16.mxu1 %v2415_v0 }
 0x1ec   :  { %2210 = vmatpush3.bf16.msra.mxu1 %v2651_v25 }
 0x1ed   :  { %2211 = vmatprep.subr.bf16.mxu1 %v2415_v0 }
 0x1ef   :  { %1877 = vmatmul.mubr.f32.vlgmr.msra.gmra.mrb[0].mxu1 %v2770_v62 }
 0x1f0   :  { %2213 = vmatpush3.bf16.msra.mxu1 %v2657_v26  ;;  %1911 = vmatprep.mubr.msk.f32.mxu1 %vm2416_vm0, %v2417_v1 }
 0x1f1   :  { %2214 = vmatprep.subr.bf16.mxu1 %v2415_v0 }
 0x1f4   :  { %2216 = vmatpush3.bf16.msra.mxu1 %v2664_v10 }
 0x1f5   :  { %2217 = vmatprep.subr.bf16.mxu1 %v2415_v0 }
 0x1f8   :  { %2219 = vmatpush3.bf16.msra.mxu1 %v2672_v34 }
 0x1f9   :  { %2220 = vmatprep.subr.bf16.mxu1 %v2415_v0 }
 0x1fc   :  { %2222 = vmatpush3.bf16.msra.mxu1 %v2678_v35 }
 0x1fd   :  { %2223 = vmatprep.subr.bf16.mxu1 %v2415_v0 }
 0x200   :  { %2225 = vmatpush3.bf16.msra.mxu1 %v2684_v43 }
 0x201   :  { %2226 = vmatprep.subr.bf16.mxu1 %v2415_v0 }
 0x204   :  { %2228 = vmatpush3.bf16.msra.mxu1 %v2690_v47 }
 0x205   :  { %2229 = vmatprep.subr.bf16.mxu1 %v2415_v0 }
 0x208   :  { %2231 = vmatpush3.bf16.msra.mxu1 %v2696_v48 }
 0x209   :  { %2232 = vmatprep.subr.bf16.mxu1 %v2415_v0 }
 0x20c   :  { %2234 = vmatpush3.bf16.msra.mxu1 %v2702_v54 }
 0x20d   :  { %2235 = vmatprep.subr.bf16.mxu1 %v2415_v0 }
 0x20f   :  { %1912 = vmatmul.mubr.f32.vlgmr.msra.gmra.mrb[0].mxu1 %v787_v63 }
 0x210   :  { %2237 = vmatpush3.bf16.msra.mxu1 %v2481_v12  ;;  %1946 = vmatprep.mubr.msk.f32.mxu1 %vm2416_vm0, %v2417_v1 }
 0x211   :  { %2238 = vmatprep.subr.bf16.mxu1 %v2415_v0 }
 0x214   :  { %2240 = vmatpush3.bf16.msra.mxu1 %v2484_v13 }
 0x215   :  { %2241 = vmatprep.subr.bf16.mxu1 %v2415_v0 }
 0x218   :  { %2243 = vmatpush3.bf16.msra.mxu1 %v2490_v18 }
 0x219   :  { %2244 = vmatprep.subr.bf16.mxu1 %v2415_v0 }
 0x21c   :  { %2246 = vmatpush3.bf16.msra.mxu1 %v2501_v32 }
 0x21d   :  { %2247 = vmatprep.subr.bf16.mxu1 %v2415_v0 }
 0x220   :  { %2249 = vmatpush3.bf16.msra.mxu1 %v2517_v44 }
 0x221   :  { %2250 = vmatprep.subr.bf16.mxu1 %v2415_v0 }
 0x224   :  { %2252 = vmatpush3.bf16.msra.mxu1 %v2528_v49 }
 0x225   :  { %2253 = vmatprep.subr.bf16.mxu1 %v2415_v0 }
 0x228   :  { %2255 = vmatpush3.bf16.msra.mxu1 %v2530_v50 }
 0x229   :  { %2256 = vmatprep.subr.bf16.mxu1 %v2415_v0 }
 0x22c   :  { %2258 = vmatpush3.bf16.msra.mxu1 %v2532_v51 }
 0x22d   :  { %2259 = vmatprep.subr.bf16.mxu1 %v2415_v0 }
 0x22f   :  { %1947 = vmatmul.mubr.f32.vlgmr.msra.gmra.mrb[0].mxu1 %v788_v2 }
 0x230   :  { %2261 = vmatpush3.bf16.msra.mxu1 %v2586_v27  ;;  %1981 = vmatprep.mubr.msk.f32.mxu1 %vm2416_vm0, %v2417_v1 }
 0x231   :  { %2262 = vmatprep.subr.bf16.mxu1 %v2415_v0 }
 0x234   :  { %2264 = vmatpush3.bf16.msra.mxu1 %v2588_v28  ;;  %v1394_v28 = vld [vmem:[%s2886_s2] ss:$0 sm:$0xff] }
 0x235   :  { %2265 = vmatprep.subr.bf16.mxu1 %v2415_v0 }
 0x238   :  { %2267 = vmatpush3.bf16.msra.mxu1 %v2590_v29 }
 0x239   :  { %2268 = vmatprep.subr.bf16.mxu1 %v2415_v0 }
 0x23c   :  { %2270 = vmatpush3.bf16.msra.mxu1 %v2593_v30 }
 0x23d   :  { %2271 = vmatprep.subr.bf16.mxu1 %v2415_v0 }
 0x240   :  { %2273 = vmatpush3.bf16.msra.mxu1 %v2595_v33 }
 0x241   :  { %2274 = vmatprep.subr.bf16.mxu1 %v2415_v0 }
 0x244   :  { %2276 = vmatpush3.bf16.msra.mxu1 %v2597_v36 }
 0x245   :  { %2277 = vmatprep.subr.bf16.mxu1 %v2415_v0 }
 0x248   :  { %2279 = vmatpush3.bf16.msra.mxu1 %v2599_v37 }
 0x249   :  { %2280 = vmatprep.subr.bf16.mxu1 %v2415_v0 }
 0x24c   :  { %2282 = vmatpush3.bf16.msra.mxu1 %v2602_v38 }
 0x24d   :  { %2283 = vmatprep.subr.bf16.mxu1 %v2415_v0 }
 0x24f   :  { %1982 = vmatmul.mubr.f32.vlgmr.msra.gmra.mrb[0].mxu1 %v2770_v62 }
 0x250   :  { %2285 = vmatpush3.bf16.msra.mxu1 %v2481_v12  ;;  %2016 = vmatprep.mubr.msk.f32.mxu1 %vm2416_vm0, %v2417_v1 }
 0x251   :  { %2286 = vmatprep.subr.bf16.mxu1 %v2415_v0 }
 0x254   :  { %2288 = vmatpush3.bf16.msra.mxu1 %v2484_v13 }
 0x255   :  { %2289 = vmatprep.subr.bf16.mxu1 %v2415_v0 }
 0x258   :  { %2291 = vmatpush3.bf16.msra.mxu1 %v2490_v18 }
 0x259   :  { %2292 = vmatprep.subr.bf16.mxu1 %v2415_v0 }
 0x25c   :  { %2294 = vmatpush3.bf16.msra.mxu1 %v2501_v32 }
 0x25d   :  { %2295 = vmatprep.subr.bf16.mxu1 %v2415_v0 }
 0x260   :  { %2297 = vmatpush3.bf16.msra.mxu1 %v2517_v44 }
 0x261   :  { %2298 = vmatprep.subr.bf16.mxu1 %v2415_v0 }
 0x264   :  { %2300 = vmatpush3.bf16.msra.mxu1 %v2528_v49 }
 0x265   :  { %2301 = vmatprep.subr.bf16.mxu1 %v2415_v0 }
 0x268   :  { %2303 = vmatpush3.bf16.msra.mxu1 %v2530_v50 }
 0x269   :  { %2304 = vmatprep.subr.bf16.mxu1 %v2415_v0 }
 0x26c   :  { %2306 = vmatpush3.bf16.msra.mxu1 %v2532_v51  ;;  %v1393_v51 = vld [vmem:[%s2885_s1] ss:$0 sm:$0xff] }
 0x26f   :  { %2017 = vmatmul.mubr.f32.vlgmr.msra.gmra.mrb[0].mxu1 %v2770_v62 }
 0x342   :  { %v1342_v1 = vpop.f32.mrb[0].mxu1 }
 0x343   :  { %v1346_v12 = vmul.f32 0.032258064, %v1342_v1  ;;  %v2018_v13 = vpop.f32.mrb[1].mxu1 }
 0x345   :  { %2335 = vrsqrt.f32 %v1346_v12  ;;  %vm1349_vm1 = vcmp.eq.f32.partialorder %v1346_v12, inf  ;;  %v1352_v31 = vand.u32 2147483648, %v1346_v12  ;;  %vm1351_vm2 = vcmp.eq.f32.partialorder %v1346_v12, 0.0 }
 0x34f   :  { %v2336_v18 = vpop.eup %2335 }
 0x350   :  { %v1348_v22 = vmul.f32 %v2336_v18, %v1346_v12 }
 0x352   :  { %v1350_v32 = vsel %vm1349_vm1, %v1346_v12, %v1348_v22 }
 0x353   :  { %v1353_v44 = vsel %vm1351_vm2, %v1352_v31, %v1350_v32 }
 0x354   :  { %v1354_v49 = vadd.f32 1e-06, %v1353_v44 }
 0x356   :  { %2337 = vrcp.f32 %v1354_v49 }
 0x360   :  { %v2338_v50 = vpop.eup %2337 }
 0x361   :  { %v1356_v5 = vmul.f32 %v2338_v50, %v1354_v49 }
 0x363   :  { %v1357_v0 = vsub.f32 2.0, %v1356_v5 }
 0x365   :  { %v1358_v9 = vmul.f32 %v2338_v50, %v1357_v0 }
 0x367   :  { %v1359_v27 = vmul.f32 %v1358_v9, %v2766_v59 }
 0x369   :  { %v1367_v29 = vmul.f32 %v1393_v51, %v1359_v27 }
 0x36b   :  { %v1375_v30 = vadd.f32 %v1394_v28, %v1367_v29 }
 0x36d   :  { %1376 = vst [vmem:[#allocation7] sm:$0xff] %v1375_v30 }
 0x36e   :  { %2394 = shalt.err (!%p2391_p6)
}
 0x36f   :  { %s2395_s21 = scalar_lea.hbm %s2888_s4, 128 }
 0x370   :  { %p2396_p7 = scmp.ne.s32.totalorder %s2888_s4, %s2395_s21  ;;  %p2399_p8 = scmp.lt.u32.totalorder %s2395_s21, %s2888_s4 }
 0x372   :  { %p2401_p9 = pnand %p2399_p8, %p2396_p7 }
 0x374   :  { %2404 = shalt.err (!%p2401_p9)
}
 0x375   :  { %1386 = dma.vmem_to_hbm [thread:$0]  %s1384_s18, 128, %s2888_s4, [#allocation4]  }
 0x376   :  { %2409 = dma.done.wait [#allocation4], 128  }
 0x377   :  { %2410 = vsyncadd [#allocation4], 4294967168 }
 0x378   :  { %1390 = vsyncpa [#allocation3], 1 }
 0x379   :  { %1391 = vsyncpa [#allocation6], 1 }
 0x37a   :  { %1392 = vsyncpa [#allocation4], 1 }

</bundles_post_ra>
